<compile_context>
chip_gen: v5e
topology: v5e:2x2
jax: 0.10.0
libtpu: 0.0.40
codegen_flags: <defaults>
</compile_context>

<pallas_src>
import math

import jax
import jax.numpy as jnp
from jax.experimental import pallas as pl
from jax.experimental.pallas import tpu as pltpu

# ----------------------------- configuration --------------------------------
B = 2              # batch (raise to amortize dispatch/weight-DMA cost)
NUM_CLASSES = 4    # num_classes
HIDDEN = 32        # hidden_size
IMG = 16           # spatial size of the synthetic image inputs
PIX = IMG * IMG
FUSED30 = 30       # "fused_30" width of the PhyModel stand-in
PHY_EXTRACT = 8    # "extracted_values" width of the PhyModel stand-in

_F32 = jnp.float32
_BF16 = jnp.bfloat16

# packed weight widths / layout
_ENC_OUT = 2 * HIDDEN                                  # shared + distinct per stream
_PHY_OUT = HIDDEN + FUSED30 + PHY_EXTRACT              # 70: y_256 | fused_30 | extracted
_IN_PROJ_W = 2 * _ENC_OUT + _PHY_OUT                   # 198
_HEADS_IN = 3 * HIDDEN                                 # 96 (block-diag head input)
_HEADS_W = 3 * NUM_CLASSES                             # 12
_K_OFF = 128                                           # lane-aligned start of k block
_ATTN_W = _K_OFF + NUM_CLASSES * HIDDEN                # 256
FF_W = NUM_CLASSES * HIDDEN                            # 128 (feat_final lane width)
assert 2 * HIDDEN + NUM_CLASSES <= _K_OFF

# lane-dense packed "misc" output slab layout (column order inside the kernel)
_MISC_FIELDS = (
    ("feat_vibration_shared", HIDDEN),
    ("feat_pressure_shared", HIDDEN),
    ("feat_vibration_distinct", HIDDEN),
    ("feat_pressure_distinct", HIDDEN),
    ("y_256", HIDDEN),
    ("fused_30", FUSED30),
    ("extracted_values", PHY_EXTRACT),
    ("pred_shared", NUM_CLASSES),
    ("pred_vibration", NUM_CLASSES),
    ("pred_pressure", NUM_CLASSES),
    ("y_pred_phy", NUM_CLASSES),
    ("pred_final", NUM_CLASSES),
    ("attn_weights", 4 * NUM_CLASSES),
)
_MISC_USED = sum(w for _, w in _MISC_FIELDS)
MISC_WIDTH = ((_MISC_USED + 127) // 128) * 128         # round up to full lane tiles
_MISC_PAD = MISC_WIDTH - _MISC_USED


# ------------------------------- fused kernel --------------------------------
def _pimfuse_kernel(pairs_ref, x_all_ref,
                    w_in_ref, b_in_ref,
                    w_heads_ref, b_heads_ref,
                    w1_ref, b1_ref, w2_ref, b2_ref, w3_ref, b3_ref,
                    w_attn_ref, b_attn_ref,
                    ones_blk_ref, rep_blk_ref, wo_blk_ref, bo_ref,
                    ff_ref, misc_ref):
    H, C, Bb = HIDDEN, NUM_CLASSES, B

    p = pairs_ref[...]                                  # [B, 1] (0. / 1.)
    p_h = jnp.broadcast_to(p, (Bb, H))                  # hoisted broadcasts
    omp_h = 1.0 - p_h

    # ---- stage 1: all three input-stream projections in ONE bf16 MXU matmul -
    # w_in columns: [vib_shared | vib_distinct | press_shared | press_distinct |
    #                phy_256 | phy_fused30 | phy_extract]
    x_all = x_all_ref[...]                              # [3B, PIX] bf16 = [S_V; S_P; S_P1]
    h_all = jnp.dot(x_all, w_in_ref[...],
                    preferred_element_type=jnp.float32) + b_in_ref[...]
    shared_v   = jnp.maximum(h_all[0:Bb,            0:H], 0.0)
    distinct_v = jnp.maximum(h_all[0:Bb,          H:2 * H], 0.0)
    shared_p   = jnp.maximum(h_all[Bb:2 * Bb, 2 * H:3 * H], 0.0)
    distinct_p = jnp.maximum(h_all[Bb:2 * Bb, 3 * H:4 * H], 0.0)
    # phy outputs stay one adjacent lane slab (y_256 | fused_30 | extracted);
    # relu only the y_256 lanes via a lane-index select (no re-concat later)
    phy_raw = h_all[2 * Bb:3 * Bb, 4 * H:4 * H + _PHY_OUT]               # [B, 70]
    lane = jax.lax.broadcasted_iota(jnp.int32, phy_raw.shape, 1)
    phy_group = jnp.where(lane < H, jnp.maximum(phy_raw, 0.0), phy_raw)
    y256 = phy_group[:, 0:H]

    # ---- stage 2: three class heads as ONE block-diagonal matmul ------------
    # output lanes already in final misc order: pred_vib | pred_press | y_pred_phy
    x_heads = jnp.concatenate([distinct_v, distinct_p, y256], axis=-1)   # [B, 3H]
    heads_out = jnp.dot(x_heads.astype(_BF16), w_heads_ref[...],
                        preferred_element_type=jnp.float32) + b_heads_ref[...]  # [B, 12]

    # ---- stage 3: shared_project applied once to the stacked shared feats ---
    x_sp = jnp.concatenate([shared_v, shared_p], axis=0)                 # [2B, H]
    t = jnp.maximum(jnp.dot(x_sp.astype(_BF16), w1_ref[...],
                            preferred_element_type=jnp.float32) + b1_ref[...], 0.0)
    t = jnp.maximum(jnp.dot(t.astype(_BF16), w2_ref[...],
                            preferred_element_type=jnp.float32) + b2_ref[...], 0.0)
    proj = jnp.dot(t.astype(_BF16), w3_ref[...],
                   preferred_element_type=jnp.float32) + b3_ref[...]
    h1 = proj[0:Bb, :]        # projected feat_vibration_shared
    h2 = proj[Bb:2 * Bb, :]   # projected feat_pressure_shared

    # ---- stage 4: folded logsumexp difference + pairs blend ------------------
    # lse([s,s,h1,h2]) - lse([0,0,h1,h2]) = log(2e^s+e^h1+e^h2) - log(2+e^h1+e^h2)
    # single shared max shift (safe at these activation magnitudes), f32 math
    s = h1 + h2
    m = jnp.maximum(jnp.maximum(s, h1), jnp.maximum(h2, 0.0))
    es = jnp.exp(s - m)
    e1 = jnp.exp(h1 - m)
    e2 = jnp.exp(h2 - m)
    ez = jnp.exp(-m)
    lse_diff = jnp.log(2.0 * es + e1 + e2) - jnp.log(2.0 * ez + e1 + e2)
    feat_avg = p_h * lse_diff + omp_h * h2                               # [B, H]

    # ---- stage 5: attention projection (4 positions stacked) + pred_shared --
    # packed w_attn lanes: [ q(H) | v(H) | wf(C) | pad ]_{0:128} [ k-block(C*H) ]_{128:256}
    x_attn = jnp.concatenate([distinct_p, feat_avg, y256, distinct_v], axis=0)  # [4B, H]
    qkv = jnp.dot(x_attn.astype(_BF16), w_attn_ref[...],
                  preferred_element_type=jnp.float32) + b_attn_ref[...]         # [4B, 256]
    pred_shared = qkv[Bb:2 * Bb, 2 * H:2 * H + C]        # fuse_model_shared(feat_avg)

    qs = qkv[:, 0:H]
    q0 = qs[0:Bb]; q1 = qs[Bb:2 * Bb]; q2 = qs[2 * Bb:3 * Bb]; q3 = qs[3 * Bb:4 * Bb]
    q_mean = (p_h * ((q0 + q1 + q2 + q3) * 0.25)
              + omp_h * ((q0 + q1 + q2) * (1.0 / 3.0)))                  # [B, H]

    # attention logits via one block-diagonal MXU contraction (no XLU reduces).
    # q replication: one lane tile + one sublane concat (no 2-axis tile).
    q_rep = jnp.tile(q_mean, (1, C))                                     # [B, C*H]
    q_rep4 = jnp.concatenate([q_rep, q_rep, q_rep, q_rep], axis=0)       # [4B, C*H]
    kblock = qkv[:, _K_OFF:_K_OFF + C * H]                               # [4B, C*H] aligned
    inv_sqrt = 1.0 / math.sqrt(H)
    logits_all = jnp.dot(kblock * q_rep4, ones_blk_ref[...],
                         preferred_element_type=jnp.float32) * inv_sqrt  # [4B, C]
    l0 = logits_all[0:Bb];          l1 = logits_all[Bb:2 * Bb]
    l2 = logits_all[2 * Bb:3 * Bb]; l3 = logits_all[3 * Bb:4 * Bb]

    # unpaired samples (pairs == 0) must not attend to the vibration-distinct key
    unpaired = jnp.broadcast_to(p, (Bb, C)) == 0.0
    l3 = jnp.where(unpaired, jnp.float32(-1e30), l3)    # finite mask (robust vs -inf)

    # softmax over the 4 keys, kept as four [B, C] slabs (all 2-D f32 ops)
    mx = jnp.maximum(jnp.maximum(l0, l1), jnp.maximum(l2, l3))
    x0 = jnp.exp(l0 - mx); x1 = jnp.exp(l1 - mx)
    x2 = jnp.exp(l2 - mx); x3 = jnp.exp(l3 - mx)
    inv_den = 1.0 / (x0 + x1 + x2 + x3)
    a0 = x0 * inv_den; a1 = x1 * inv_den; a2 = x2 * inv_den; a3 = x3 * inv_den
    attn_flat = jnp.concatenate([a0, a1, a2, a3], axis=-1)               # [B, 4C] ([n,c])

    # ---- stage 6: feat_final built lane-dense [B, C*H] ------------------------
    # a_rep[b, c*H+d] = a_n[b,c] via ONE matmul against the block-diag rep matrix;
    # v replicated with ONE lane tile; reduce over the 4 keys by sublane slices.
    a_all = jnp.concatenate([a0, a1, a2, a3], axis=0)                    # [4B, C]
    a_rep = jnp.dot(a_all, rep_blk_ref[...],
                    preferred_element_type=jnp.float32)                  # [4B, C*H]
    v_tile = jnp.tile(qkv[:, H:2 * H], (1, C))                           # [4B, C*H]
    prod_v = a_rep * v_tile
    ff_flat = (prod_v[0:Bb] + prod_v[Bb:2 * Bb]
               + prod_v[2 * Bb:3 * Bb] + prod_v[3 * Bb:4 * Bb])          # [B, C*H]

    # diag(final_pred_fc(feat_final)) as one block-diagonal matmul
    pred_final = jnp.dot(ff_flat, wo_blk_ref[...],
                         preferred_element_type=jnp.float32) + bo_ref[...]  # [B, C]

    # ---- lane-dense output slabs (two aligned 128-lane misc groups) ----------
    ff_ref[...] = ff_flat                                                # [B, 128]
    misc_ref[:, 0:128] = jnp.concatenate(
        [h1, h2, distinct_v, distinct_p], axis=-1)                       # 4 x 32 = 128
    misc_ref[:, 128:MISC_WIDTH] = jnp.concatenate(
        [phy_group, pred_shared, heads_out, pred_final, attn_flat,
         jnp.zeros((Bb, _MISC_PAD), dtype=jnp.float32)], axis=-1)        # 70+4+12+4+16+22


# ------------------------------ pallas wrapper --------------------------------
def _vmem_spec():
    return pl.BlockSpec(memory_space=pltpu.MemorySpace.VMEM)


def _pimfuse_call(pairs2, x_all, prm):
    args = (pairs2, x_all,
            prm["w_in"], prm["b_in"], prm["w_heads"], prm["b_heads"],
            prm["w1"], prm["b1"], prm["w2"], prm["b2"], prm["w3"], prm["b3"],
            prm["w_attn"], prm["b_attn"],
            prm["ones_blk"], prm["rep_blk"], prm["wo_blk"], prm["bo"])
    out_shapes = (
        jax.ShapeDtypeStruct((B, FF_W), _F32),           # feat_final (flat, lane-dense)
        jax.ShapeDtypeStruct((B, MISC_WIDTH), _F32),     # packed misc slab
    )
    return pl.pallas_call(
        _pimfuse_kernel,
        out_shape=out_shapes,
        in_specs=[_vmem_spec() for _ in range(len(args))],
        out_specs=(_vmem_spec(), _vmem_spec()),
    )(*args)


# ---------------------------------- params ------------------------------------
def init_params(key):
    keys = iter(jax.random.split(key, 64))

    def w(shape, scale=0.05):
        return (scale * jax.random.normal(next(keys), shape)).astype(_F32)

    # stand-in backbone weights (logical layout)
    wv_s, bv_s = w((PIX, HIDDEN)), w((1, HIDDEN))
    wv_d, bv_d = w((PIX, HIDDEN)), w((1, HIDDEN))
    wph_v, bph_v = w((HIDDEN, NUM_CLASSES)), w((1, NUM_CLASSES))

    wp_s, bp_s = w((PIX, HIDDEN)), w((1, HIDDEN))
    wp_d, bp_d = w((PIX, HIDDEN)), w((1, HIDDEN))
    wph_p, bph_p = w((HIDDEN, NUM_CLASSES)), w((1, NUM_CLASSES))

    w256, b256 = w((PIX, HIDDEN)), w((1, HIDDEN))
    w30, b30 = w((PIX, FUSED30)), w((1, FUSED30))
    wphy, bphy = w((HIDDEN, NUM_CLASSES)), w((1, NUM_CLASSES))
    wext, bext = w((PIX, PHY_EXTRACT)), w((1, PHY_EXTRACT))

    # fusion head weights
    w1, b1 = w((HIDDEN, 2 * HIDDEN)), w((1, 2 * HIDDEN))
    w2, b2 = w((2 * HIDDEN, HIDDEN)), w((1, HIDDEN))
    w3, b3 = w((HIDDEN, HIDDEN)), w((1, HIDDEN))
    wf, bf = w((HIDDEN, NUM_CLASSES)), w((1, NUM_CLASSES))
    wa, ba = w((HIDDEN, (2 + NUM_CLASSES) * HIDDEN)), w((1, (2 + NUM_CLASSES) * HIDDEN))
    wo, bo = w((HIDDEN, NUM_CLASSES)), w((1, NUM_CLASSES))

    H, C = HIDDEN, NUM_CLASSES

    # packed input projection (bf16 halves the dominant weight DMA)
    w_in = jnp.concatenate([wv_s, wv_d, wp_s, wp_d, w256, w30, wext], axis=1)
    b_in = jnp.concatenate([bv_s, bv_d, bp_s, bp_d, b256, b30, bext], axis=1)

    # block-diagonal class heads: [head_vib | head_press | head_phy] come out adjacent
    w_heads = jnp.zeros((_HEADS_IN, _HEADS_W), _F32)
    w_heads = w_heads.at[0:H, 0:C].set(wph_v)
    w_heads = w_heads.at[H:2 * H, C:2 * C].set(wph_p)
    w_heads = w_heads.at[2 * H:3 * H, 2 * C:3 * C].set(wphy)
    b_heads = jnp.concatenate([bph_v, bph_p, bphy], axis=1)

    # 128-lane aligned attention projection:
    #   lanes [0:H]=q, [H:2H]=v, [2H:2H+C]=fuse_model_shared, pad, [128:256]=k block
    w_attn = jnp.zeros((H, _ATTN_W), _F32)
    w_attn = w_attn.at[:, 0:H].set(wa[:, 0:H])
    w_attn = w_attn.at[:, H:2 * H].set(wa[:, H:2 * H])
    w_attn = w_attn.at[:, 2 * H:2 * H + C].set(wf)
    w_attn = w_attn.at[:, _K_OFF:_K_OFF + C * H].set(wa[:, 2 * H:])
    b_attn = jnp.zeros((1, _ATTN_W), _F32)
    b_attn = b_attn.at[:, 0:H].set(ba[:, 0:H])
    b_attn = b_attn.at[:, H:2 * H].set(ba[:, H:2 * H])
    b_attn = b_attn.at[:, 2 * H:2 * H + C].set(bf)
    b_attn = b_attn.at[:, _K_OFF:_K_OFF + C * H].set(ba[:, 2 * H:])

    # block-diagonal MXU constants (replace per-class lane loops in-kernel)
    rep_blk = jnp.kron(jnp.eye(C, dtype=_F32), jnp.ones((1, H), _F32))   # [C, C*H]
    ones_blk = rep_blk.T                                                 # [C*H, C]
    wo_blk = ones_blk * jnp.tile(wo, (C, 1))                             # [C*H, C], diag blocks = wo[:,c]

    params = dict(
        w_in=w_in.astype(_BF16), b_in=b_in,
        w_heads=w_heads.astype(_BF16), b_heads=b_heads,
        w1=w1.astype(_BF16), b1=b1,
        w2=w2.astype(_BF16), b2=b2,
        w3=w3.astype(_BF16), b3=b3,
        w_attn=w_attn.astype(_BF16), b_attn=b_attn,
        ones_blk=ones_blk, rep_blk=rep_blk, wo_blk=wo_blk, bo=bo,
    )
    assert params["w_in"].shape == (PIX, _IN_PROJ_W)
    assert params["w_heads"].shape == (_HEADS_IN, _HEADS_W)
    assert params["w_attn"].shape == (HIDDEN, _ATTN_W)
    assert params["wo_blk"].shape == (NUM_CLASSES * HIDDEN, NUM_CLASSES)
    return params


# ---------------------------------- forward -----------------------------------
@jax.jit
def pim_fuse_forward(pairs, S_V, S_P, S_P1, params):
    b = S_V.shape[0]
    # pre-pack the three image streams into one bf16 slab -> one halved input DMA
    # (at large B, pre-pack x_all outside the hot path instead)
    x_all = jnp.concatenate(
        [S_V.reshape(b, -1), S_P.reshape(b, -1), S_P1.reshape(b, -1)],
        axis=0).astype(_BF16)                                  # [3B, PIX]
    pairs2 = pairs.reshape(b, 1).astype(_F32)                  # pairs.unsqueeze(1)

    ff_flat, misc = _pimfuse_call(pairs2, x_all, params)

    # unpack the lane-dense misc slab
    out = {}
    off = 0
    for name, width in _MISC_FIELDS:
        out[name] = misc[:, off:off + width]
        off += width

    out["feat_final"] = ff_flat.reshape(b, NUM_CLASSES, HIDDEN)
    # attn_flat layout is [b, n*C + c]  ->  [B, C, 4]
    out["attn_weights"] = jnp.transpose(
        out["attn_weights"].reshape(b, 4, NUM_CLASSES), (0, 2, 1))
    out["S_P1"] = S_P1
    return out


# ------------------------------------ main -------------------------------------
if __name__ == "__main__":
    key = jax.random.PRNGKey(0)
    k_params, k_sv, k_sp, k_sp1 = jax.random.split(key, 4)
    params = init_params(k_params)

    pairs = jnp.array([1.0, 0.0], dtype=_F32)          # one paired, one unpaired sample
    S_V = jax.random.normal(k_sv, (B, 1, IMG, IMG), dtype=_F32)
    S_P = jax.random.normal(k_sp, (B, 1, IMG, IMG), dtype=_F32)
    S_P1 = jax.random.normal(k_sp1, (B, 1, IMG, IMG), dtype=_F32)

    outputs = pim_fuse_forward(pairs, S_V, S_P, S_P1, params)
    jax.block_until_ready(outputs)

    # light sanity checks on shapes / softmax normalization / mask behavior
    assert outputs["pred_final"].shape == (B, NUM_CLASSES)
    assert outputs["feat_final"].shape == (B, NUM_CLASSES, HIDDEN)
    assert outputs["attn_weights"].shape == (B, NUM_CLASSES, 4)
    assert outputs["pred_shared"].shape == (B, NUM_CLASSES)
    assert outputs["pred_vibration"].shape == (B, NUM_CLASSES)
    assert outputs["pred_pressure"].shape == (B, NUM_CLASSES)
    assert outputs["y_pred_phy"].shape == (B, NUM_CLASSES)
    assert outputs["fused_30"].shape == (B, FUSED30)
    assert outputs["extracted_values"].shape == (B, PHY_EXTRACT)
    assert bool(jnp.allclose(jnp.sum(outputs["attn_weights"], axis=-1), 1.0, atol=1e-5))
    # unpaired sample (index 1) must place ~zero weight on the last (vibration) key
    assert bool(jnp.all(outputs["attn_weights"][1, :, 3] < 1e-6))

    print("KERNEL_OK")
</pallas_src>

<mosaic_0001>
module attributes {stable_mosaic.version = 11 : i64} {
  func.func @_pimfuse_kernel(%arg0: memref<2x1xf32, #tpu.memory_space<vmem>>, %arg1: memref<6x256xbf16, #tpu.memory_space<vmem>>, %arg2: memref<256x198xbf16, #tpu.memory_space<vmem>>, %arg3: memref<1x198xf32, #tpu.memory_space<vmem>>, %arg4: memref<96x12xbf16, #tpu.memory_space<vmem>>, %arg5: memref<1x12xf32, #tpu.memory_space<vmem>>, %arg6: memref<32x64xbf16, #tpu.memory_space<vmem>>, %arg7: memref<1x64xf32, #tpu.memory_space<vmem>>, %arg8: memref<64x32xbf16, #tpu.memory_space<vmem>>, %arg9: memref<1x32xf32, #tpu.memory_space<vmem>>, %arg10: memref<32x32xbf16, #tpu.memory_space<vmem>>, %arg11: memref<1x32xf32, #tpu.memory_space<vmem>>, %arg12: memref<32x256xbf16, #tpu.memory_space<vmem>>, %arg13: memref<1x256xf32, #tpu.memory_space<vmem>>, %arg14: memref<128x4xf32, #tpu.memory_space<vmem>>, %arg15: memref<4x128xf32, #tpu.memory_space<vmem>>, %arg16: memref<128x4xf32, #tpu.memory_space<vmem>>, %arg17: memref<1x4xf32, #tpu.memory_space<vmem>>, %arg18: memref<2x128xf32, #tpu.memory_space<vmem>>, %arg19: memref<2x256xf32, #tpu.memory_space<vmem>>) attributes {dimension_semantics = [], scalar_prefetch = 0 : i64, scratch_operands = 0 : i64, tpu.core_type = #tpu.core_type<tc>} {
    %c0 = arith.constant 0 : index
    %c0_0 = arith.constant 0 : index
    %0 = vector.load %arg0[%c0, %c0_0] : memref<2x1xf32, #tpu.memory_space<vmem>>, vector<2x1xf32>
    %1 = vector.shape_cast %0 : vector<2x1xf32> to vector<2x1xf32>
    %2 = vector.broadcast %1 : vector<2x1xf32> to vector<2x32xf32>
    %cst = arith.constant 1.000000e+00 : f32
    %3 = vector.broadcast %cst : f32 to vector<2x32xf32>
    %4 = arith.subf %3, %2 : vector<2x32xf32>
    %c0_1 = arith.constant 0 : index
    %c0_2 = arith.constant 0 : index
    %5 = vector.load %arg1[%c0_1, %c0_2] : memref<6x256xbf16, #tpu.memory_space<vmem>>, vector<6x256xbf16>
    %c0_3 = arith.constant 0 : index
    %c0_4 = arith.constant 0 : index
    %6 = vector.load %arg2[%c0_3, %c0_4] : memref<256x198xbf16, #tpu.memory_space<vmem>>, vector<256x198xbf16>
    %cst_5 = arith.constant dense<0.000000e+00> : vector<6x198xf32>
    %7 = tpu.matmul %5, %6, %cst_5 {dimension_numbers = #tpu.dot_dimension_numbers<[1], [0], [0], [1], [0, 0, 1, 1], [], []>} : vector<6x256xbf16>, vector<256x198xbf16>, vector<6x198xf32> -> vector<6x198xf32>
    %c0_6 = arith.constant 0 : index
    %c0_7 = arith.constant 0 : index
    %8 = vector.load %arg3[%c0_6, %c0_7] : memref<1x198xf32, #tpu.memory_space<vmem>>, vector<1x198xf32>
    %9 = vector.broadcast %8 : vector<1x198xf32> to vector<6x198xf32>
    %10 = arith.addf %7, %9 : vector<6x198xf32>
    %11 = vector.extract_strided_slice %10 {offsets = [0, 0], sizes = [2, 32], strides = [1, 1]} : vector<6x198xf32> to vector<2x32xf32>
    %cst_8 = arith.constant 0.000000e+00 : f32
    %12 = vector.broadcast %cst_8 : f32 to vector<2x32xf32>
    %13 = arith.maximumf %11, %12 : vector<2x32xf32>
    %14 = vector.extract_strided_slice %10 {offsets = [0, 32], sizes = [2, 32], strides = [1, 1]} : vector<6x198xf32> to vector<2x32xf32>
    %cst_9 = arith.constant 0.000000e+00 : f32
    %15 = vector.broadcast %cst_9 : f32 to vector<2x32xf32>
    %16 = arith.maximumf %14, %15 : vector<2x32xf32>
    %17 = vector.extract_strided_slice %10 {offsets = [2, 64], sizes = [2, 32], strides = [1, 1]} : vector<6x198xf32> to vector<2x32xf32>
    %cst_10 = arith.constant 0.000000e+00 : f32
    %18 = vector.broadcast %cst_10 : f32 to vector<2x32xf32>
    %19 = arith.maximumf %17, %18 : vector<2x32xf32>
    %20 = vector.extract_strided_slice %10 {offsets = [2, 96], sizes = [2, 32], strides = [1, 1]} : vector<6x198xf32> to vector<2x32xf32>
    %cst_11 = arith.constant 0.000000e+00 : f32
    %21 = vector.broadcast %cst_11 : f32 to vector<2x32xf32>
    %22 = arith.maximumf %20, %21 : vector<2x32xf32>
    %23 = vector.extract_strided_slice %10 {offsets = [4, 128], sizes = [2, 70], strides = [1, 1]} : vector<6x198xf32> to vector<2x70xf32>
    %24 = tpu.iota {dimensions = array<i32: 1>} : vector<2x70xi32>
    %c32_i32 = arith.constant 32 : i32
    %25 = vector.broadcast %c32_i32 : i32 to vector<2x70xi32>
    %26 = arith.cmpi slt, %24, %25 : vector<2x70xi32>
    %cst_12 = arith.constant 0.000000e+00 : f32
    %27 = vector.broadcast %cst_12 : f32 to vector<2x70xf32>
    %28 = arith.maximumf %23, %27 : vector<2x70xf32>
    %29 = arith.select %26, %28, %23 : vector<2x70xi1>, vector<2x70xf32>
    %30 = vector.extract_strided_slice %29 {offsets = [0, 0], sizes = [2, 32], strides = [1, 1]} : vector<2x70xf32> to vector<2x32xf32>
    %31 = tpu.concatenate %16, %22, %30 in 1 : vector<2x32xf32>, vector<2x32xf32>, vector<2x32xf32> -> vector<2x96xf32>
    %32 = arith.truncf %31 : vector<2x96xf32> to vector<2x96xbf16>
    %c0_13 = arith.constant 0 : index
    %c0_14 = arith.constant 0 : index
    %33 = vector.load %arg4[%c0_13, %c0_14] : memref<96x12xbf16, #tpu.memory_space<vmem>>, vector<96x12xbf16>
    %cst_15 = arith.constant dense<0.000000e+00> : vector<2x12xf32>
    %34 = tpu.matmul %32, %33, %cst_15 {dimension_numbers = #tpu.dot_dimension_numbers<[1], [0], [0], [1], [0, 0, 1, 1], [], []>} : vector<2x96xbf16>, vector<96x12xbf16>, vector<2x12xf32> -> vector<2x12xf32>
    %c0_16 = arith.constant 0 : index
    %c0_17 = arith.constant 0 : index
    %35 = vector.load %arg5[%c0_16, %c0_17] : memref<1x12xf32, #tpu.memory_space<vmem>>, vector<1x12xf32>
    %36 = vector.broadcast %35 : vector<1x12xf32> to vector<2x12xf32>
    %37 = arith.addf %34, %36 : vector<2x12xf32>
    %38 = tpu.concatenate %13, %19 in 0 : vector<2x32xf32>, vector<2x32xf32> -> vector<4x32xf32>
    %39 = arith.truncf %38 : vector<4x32xf32> to vector<4x32xbf16>
    %c0_18 = arith.constant 0 : index
    %c0_19 = arith.constant 0 : index
    %40 = vector.load %arg6[%c0_18, %c0_19] : memref<32x64xbf16, #tpu.memory_space<vmem>>, vector<32x64xbf16>
    %cst_20 = arith.constant dense<0.000000e+00> : vector<4x64xf32>
    %41 = tpu.matmul %39, %40, %cst_20 {dimension_numbers = #tpu.dot_dimension_numbers<[1], [0], [0], [1], [0, 0, 1, 1], [], []>} : vector<4x32xbf16>, vector<32x64xbf16>, vector<4x64xf32> -> vector<4x64xf32>
    %c0_21 = arith.constant 0 : index
    %c0_22 = arith.constant 0 : index
    %42 = vector.load %arg7[%c0_21, %c0_22] : memref<1x64xf32, #tpu.memory_space<vmem>>, vector<1x64xf32>
    %43 = vector.broadcast %42 : vector<1x64xf32> to vector<4x64xf32>
    %44 = arith.addf %41, %43 : vector<4x64xf32>
    %cst_23 = arith.constant 0.000000e+00 : f32
    %45 = vector.broadcast %cst_23 : f32 to vector<4x64xf32>
    %46 = arith.maximumf %44, %45 : vector<4x64xf32>
    %47 = arith.truncf %46 : vector<4x64xf32> to vector<4x64xbf16>
    %c0_24 = arith.constant 0 : index
    %c0_25 = arith.constant 0 : index
    %48 = vector.load %arg8[%c0_24, %c0_25] : memref<64x32xbf16, #tpu.memory_space<vmem>>, vector<64x32xbf16>
    %cst_26 = arith.constant dense<0.000000e+00> : vector<4x32xf32>
    %49 = tpu.matmul %47, %48, %cst_26 {dimension_numbers = #tpu.dot_dimension_numbers<[1], [0], [0], [1], [0, 0, 1, 1], [], []>} : vector<4x64xbf16>, vector<64x32xbf16>, vector<4x32xf32> -> vector<4x32xf32>
    %c0_27 = arith.constant 0 : index
    %c0_28 = arith.constant 0 : index
    %50 = vector.load %arg9[%c0_27, %c0_28] : memref<1x32xf32, #tpu.memory_space<vmem>>, vector<1x32xf32>
    %51 = vector.broadcast %50 : vector<1x32xf32> to vector<4x32xf32>
    %52 = arith.addf %49, %51 : vector<4x32xf32>
    %cst_29 = arith.constant 0.000000e+00 : f32
    %53 = vector.broadcast %cst_29 : f32 to vector<4x32xf32>
    %54 = arith.maximumf %52, %53 : vector<4x32xf32>
    %55 = arith.truncf %54 : vector<4x32xf32> to vector<4x32xbf16>
    %c0_30 = arith.constant 0 : index
    %c0_31 = arith.constant 0 : index
    %56 = vector.load %arg10[%c0_30, %c0_31] : memref<32x32xbf16, #tpu.memory_space<vmem>>, vector<32x32xbf16>
    %cst_32 = arith.constant dense<0.000000e+00> : vector<4x32xf32>
    %57 = tpu.matmul %55, %56, %cst_32 {dimension_numbers = #tpu.dot_dimension_numbers<[1], [0], [0], [1], [0, 0, 1, 1], [], []>} : vector<4x32xbf16>, vector<32x32xbf16>, vector<4x32xf32> -> vector<4x32xf32>
    %c0_33 = arith.constant 0 : index
    %c0_34 = arith.constant 0 : index
    %58 = vector.load %arg11[%c0_33, %c0_34] : memref<1x32xf32, #tpu.memory_space<vmem>>, vector<1x32xf32>
    %59 = vector.broadcast %58 : vector<1x32xf32> to vector<4x32xf32>
    %60 = arith.addf %57, %59 : vector<4x32xf32>
    %61 = vector.extract_strided_slice %60 {offsets = [0, 0], sizes = [2, 32], strides = [1, 1]} : vector<4x32xf32> to vector<2x32xf32>
    %62 = vector.extract_strided_slice %60 {offsets = [2, 0], sizes = [2, 32], strides = [1, 1]} : vector<4x32xf32> to vector<2x32xf32>
    %63 = arith.addf %61, %62 : vector<2x32xf32>
    %64 = arith.maximumf %63, %61 : vector<2x32xf32>
    %cst_35 = arith.constant 0.000000e+00 : f32
    %65 = vector.broadcast %cst_35 : f32 to vector<2x32xf32>
    %66 = arith.maximumf %62, %65 : vector<2x32xf32>
    %67 = arith.maximumf %64, %66 : vector<2x32xf32>
    %68 = arith.subf %63, %67 : vector<2x32xf32>
    %69 = math.exp %68 : vector<2x32xf32>
    %70 = arith.subf %61, %67 : vector<2x32xf32>
    %71 = math.exp %70 : vector<2x32xf32>
    %72 = arith.subf %62, %67 : vector<2x32xf32>
    %73 = math.exp %72 : vector<2x32xf32>
    %cst_36 = arith.constant 0.000000e+00 : f32
    %74 = vector.broadcast %cst_36 : f32 to vector<2x32xf32>
    %75 = arith.subf %74, %67 : vector<2x32xf32>
    %76 = math.exp %75 : vector<2x32xf32>
    %cst_37 = arith.constant 2.000000e+00 : f32
    %77 = vector.broadcast %cst_37 : f32 to vector<2x32xf32>
    %78 = arith.mulf %77, %69 : vector<2x32xf32>
    %79 = arith.addf %78, %71 : vector<2x32xf32>
    %80 = arith.addf %79, %73 : vector<2x32xf32>
    %81 = math.log %80 : vector<2x32xf32>
    %cst_38 = arith.constant 2.000000e+00 : f32
    %82 = vector.broadcast %cst_38 : f32 to vector<2x32xf32>
    %83 = arith.mulf %82, %76 : vector<2x32xf32>
    %84 = arith.addf %83, %71 : vector<2x32xf32>
    %85 = arith.addf %84, %73 : vector<2x32xf32>
    %86 = math.log %85 : vector<2x32xf32>
    %87 = arith.subf %81, %86 : vector<2x32xf32>
    %88 = arith.mulf %2, %87 : vector<2x32xf32>
    %89 = arith.mulf %4, %62 : vector<2x32xf32>
    %90 = arith.addf %88, %89 : vector<2x32xf32>
    %91 = tpu.concatenate %22, %90, %30, %16 in 0 : vector<2x32xf32>, vector<2x32xf32>, vector<2x32xf32>, vector<2x32xf32> -> vector<8x32xf32>
    %92 = arith.truncf %91 : vector<8x32xf32> to vector<8x32xbf16>
    %c0_39 = arith.constant 0 : index
    %c0_40 = arith.constant 0 : index
    %93 = vector.load %arg12[%c0_39, %c0_40] : memref<32x256xbf16, #tpu.memory_space<vmem>>, vector<32x256xbf16>
    %cst_41 = arith.constant dense<0.000000e+00> : vector<8x256xf32>
    %94 = tpu.matmul %92, %93, %cst_41 {dimension_numbers = #tpu.dot_dimension_numbers<[1], [0], [0], [1], [0, 0, 1, 1], [], []>} : vector<8x32xbf16>, vector<32x256xbf16>, vector<8x256xf32> -> vector<8x256xf32>
    %c0_42 = arith.constant 0 : index
    %c0_43 = arith.constant 0 : index
    %95 = vector.load %arg13[%c0_42, %c0_43] : memref<1x256xf32, #tpu.memory_space<vmem>>, vector<1x256xf32>
    %96 = vector.broadcast %95 : vector<1x256xf32> to vector<8x256xf32>
    %97 = arith.addf %94, %96 : vector<8x256xf32>
    %98 = vector.extract_strided_slice %97 {offsets = [2, 64], sizes = [2, 4], strides = [1, 1]} : vector<8x256xf32> to vector<2x4xf32>
    %99 = vector.extract_strided_slice %97 {offsets = [0, 0], sizes = [8, 32], strides = [1, 1]} : vector<8x256xf32> to vector<8x32xf32>
    %100 = vector.extract_strided_slice %99 {offsets = [0, 0], sizes = [2, 32], strides = [1, 1]} : vector<8x32xf32> to vector<2x32xf32>
    %101 = vector.extract_strided_slice %99 {offsets = [2, 0], sizes = [2, 32], strides = [1, 1]} : vector<8x32xf32> to vector<2x32xf32>
    %102 = vector.extract_strided_slice %99 {offsets = [4, 0], sizes = [2, 32], strides = [1, 1]} : vector<8x32xf32> to vector<2x32xf32>
    %103 = vector.extract_strided_slice %99 {offsets = [6, 0], sizes = [2, 32], strides = [1, 1]} : vector<8x32xf32> to vector<2x32xf32>
    %104 = arith.addf %100, %101 : vector<2x32xf32>
    %105 = arith.addf %104, %102 : vector<2x32xf32>
    %106 = arith.addf %105, %103 : vector<2x32xf32>
    %cst_44 = arith.constant 2.500000e-01 : f32
    %107 = vector.broadcast %cst_44 : f32 to vector<2x32xf32>
    %108 = arith.mulf %106, %107 : vector<2x32xf32>
    %109 = arith.mulf %2, %108 : vector<2x32xf32>
    %110 = arith.addf %100, %101 : vector<2x32xf32>
    %111 = arith.addf %110, %102 : vector<2x32xf32>
    %cst_45 = arith.constant 0.333333343 : f32
    %112 = vector.broadcast %cst_45 : f32 to vector<2x32xf32>
    %113 = arith.mulf %111, %112 : vector<2x32xf32>
    %114 = arith.mulf %4, %113 : vector<2x32xf32>
    %115 = arith.addf %109, %114 : vector<2x32xf32>
    %116 = tpu.concatenate %115, %115, %115, %115 in 1 : vector<2x32xf32>, vector<2x32xf32>, vector<2x32xf32>, vector<2x32xf32> -> vector<2x128xf32>
    %117 = tpu.concatenate %116, %116, %116, %116 in 0 : vector<2x128xf32>, vector<2x128xf32>, vector<2x128xf32>, vector<2x128xf32> -> vector<8x128xf32>
    %118 = vector.extract_strided_slice %97 {offsets = [0, 128], sizes = [8, 128], strides = [1, 1]} : vector<8x256xf32> to vector<8x128xf32>
    %119 = arith.mulf %118, %117 : vector<8x128xf32>
    %c0_46 = arith.constant 0 : index
    %c0_47 = arith.constant 0 : index
    %120 = vector.load %arg14[%c0_46, %c0_47] : memref<128x4xf32, #tpu.memory_space<vmem>>, vector<128x4xf32>
    %cst_48 = arith.constant dense<0.000000e+00> : vector<8x4xf32>
    %121 = tpu.matmul %119, %120, %cst_48 {dimension_numbers = #tpu.dot_dimension_numbers<[1], [0], [0], [1], [0, 0, 1, 1], [], []>} : vector<8x128xf32>, vector<128x4xf32>, vector<8x4xf32> -> vector<8x4xf32>
    %cst_49 = arith.constant 0.176776692 : f32
    %122 = vector.broadcast %cst_49 : f32 to vector<8x4xf32>
    %123 = arith.mulf %121, %122 : vector<8x4xf32>
    %124 = vector.extract_strided_slice %123 {offsets = [0, 0], sizes = [2, 4], strides = [1, 1]} : vector<8x4xf32> to vector<2x4xf32>
    %125 = vector.extract_strided_slice %123 {offsets = [2, 0], sizes = [2, 4], strides = [1, 1]} : vector<8x4xf32> to vector<2x4xf32>
    %126 = vector.extract_strided_slice %123 {offsets = [4, 0], sizes = [2, 4], strides = [1, 1]} : vector<8x4xf32> to vector<2x4xf32>
    %127 = vector.extract_strided_slice %123 {offsets = [6, 0], sizes = [2, 4], strides = [1, 1]} : vector<8x4xf32> to vector<2x4xf32>
    %128 = vector.shape_cast %0 : vector<2x1xf32> to vector<2x1xf32>
    %129 = vector.broadcast %128 : vector<2x1xf32> to vector<2x4xf32>
    %cst_50 = arith.constant 0.000000e+00 : f32
    %130 = vector.broadcast %cst_50 : f32 to vector<2x4xf32>
    %131 = arith.cmpf oeq, %129, %130 : vector<2x4xf32>
    %cst_51 = arith.constant -1.000000e+30 : f32
    %132 = vector.broadcast %cst_51 : f32 to vector<2x4xf32>
    %133 = arith.select %131, %132, %127 : vector<2x4xi1>, vector<2x4xf32>
    %134 = arith.maximumf %124, %125 : vector<2x4xf32>
    %135 = arith.maximumf %126, %133 : vector<2x4xf32>
    %136 = arith.maximumf %134, %135 : vector<2x4xf32>
    %137 = arith.subf %124, %136 : vector<2x4xf32>
    %138 = math.exp %137 : vector<2x4xf32>
    %139 = arith.subf %125, %136 : vector<2x4xf32>
    %140 = math.exp %139 : vector<2x4xf32>
    %141 = arith.subf %126, %136 : vector<2x4xf32>
    %142 = math.exp %141 : vector<2x4xf32>
    %143 = arith.subf %133, %136 : vector<2x4xf32>
    %144 = math.exp %143 : vector<2x4xf32>
    %145 = arith.addf %138, %140 : vector<2x4xf32>
    %146 = arith.addf %145, %142 : vector<2x4xf32>
    %147 = arith.addf %146, %144 : vector<2x4xf32>
    %cst_52 = arith.constant 1.000000e+00 : f32
    %148 = vector.broadcast %cst_52 : f32 to vector<2x4xf32>
    %149 = arith.divf %148, %147 : vector<2x4xf32>
    %150 = arith.mulf %138, %149 : vector<2x4xf32>
    %151 = arith.mulf %140, %149 : vector<2x4xf32>
    %152 = arith.mulf %142, %149 : vector<2x4xf32>
    %153 = arith.mulf %144, %149 : vector<2x4xf32>
    %154 = tpu.concatenate %150, %151, %152, %153 in 1 : vector<2x4xf32>, vector<2x4xf32>, vector<2x4xf32>, vector<2x4xf32> -> vector<2x16xf32>
    %155 = tpu.concatenate %150, %151, %152, %153 in 0 : vector<2x4xf32>, vector<2x4xf32>, vector<2x4xf32>, vector<2x4xf32> -> vector<8x4xf32>
    %c0_53 = arith.constant 0 : index
    %c0_54 = arith.constant 0 : index
    %156 = vector.load %arg15[%c0_53, %c0_54] : memref<4x128xf32, #tpu.memory_space<vmem>>, vector<4x128xf32>
    %cst_55 = arith.constant dense<0.000000e+00> : vector<8x128xf32>
    %157 = tpu.matmul %155, %156, %cst_55 {dimension_numbers = #tpu.dot_dimension_numbers<[1], [0], [0], [1], [0, 0, 1, 1], [], []>} : vector<8x4xf32>, vector<4x128xf32>, vector<8x128xf32> -> vector<8x128xf32>
    %158 = vector.extract_strided_slice %97 {offsets = [0, 32], sizes = [8, 32], strides = [1, 1]} : vector<8x256xf32> to vector<8x32xf32>
    %159 = tpu.concatenate %158, %158, %158, %158 in 1 : vector<8x32xf32>, vector<8x32xf32>, vector<8x32xf32>, vector<8x32xf32> -> vector<8x128xf32>
    %160 = arith.mulf %157, %159 : vector<8x128xf32>
    %161 = vector.extract_strided_slice %160 {offsets = [0, 0], sizes = [2, 128], strides = [1, 1]} : vector<8x128xf32> to vector<2x128xf32>
    %162 = vector.extract_strided_slice %160 {offsets = [2, 0], sizes = [2, 128], strides = [1, 1]} : vector<8x128xf32> to vector<2x128xf32>
    %163 = arith.addf %161, %162 : vector<2x128xf32>
    %164 = vector.extract_strided_slice %160 {offsets = [4, 0], sizes = [2, 128], strides = [1, 1]} : vector<8x128xf32> to vector<2x128xf32>
    %165 = arith.addf %163, %164 : vector<2x128xf32>
    %166 = vector.extract_strided_slice %160 {offsets = [6, 0], sizes = [2, 128], strides = [1, 1]} : vector<8x128xf32> to vector<2x128xf32>
    %167 = arith.addf %165, %166 : vector<2x128xf32>
    %c0_56 = arith.constant 0 : index
    %c0_57 = arith.constant 0 : index
    %168 = vector.load %arg16[%c0_56, %c0_57] : memref<128x4xf32, #tpu.memory_space<vmem>>, vector<128x4xf32>
    %cst_58 = arith.constant dense<0.000000e+00> : vector<2x4xf32>
    %169 = tpu.matmul %167, %168, %cst_58 {dimension_numbers = #tpu.dot_dimension_numbers<[1], [0], [0], [1], [0, 0, 1, 1], [], []>} : vector<2x128xf32>, vector<128x4xf32>, vector<2x4xf32> -> vector<2x4xf32>
    %c0_59 = arith.constant 0 : index
    %c0_60 = arith.constant 0 : index
    %170 = vector.load %arg17[%c0_59, %c0_60] : memref<1x4xf32, #tpu.memory_space<vmem>>, vector<1x4xf32>
    %171 = vector.broadcast %170 : vector<1x4xf32> to vector<2x4xf32>
    %172 = arith.addf %169, %171 : vector<2x4xf32>
    %c0_61 = arith.constant 0 : index
    %c0_62 = arith.constant 0 : index
    %173 = vector.load %arg18[%c0_61, %c0_62] : memref<2x128xf32, #tpu.memory_space<vmem>>, vector<2x128xf32>
    tpu.vector_store %arg18[%c0_61, %c0_62], %167 {strides = array<i32>} : memref<2x128xf32, #tpu.memory_space<vmem>>, vector<2x128xf32>,
    %174 = tpu.concatenate %61, %62, %16, %22 in 1 : vector<2x32xf32>, vector<2x32xf32>, vector<2x32xf32>, vector<2x32xf32> -> vector<2x128xf32>
    %c0_63 = arith.constant 0 : index
    %c0_64 = arith.constant 0 : index
    %175 = vector.load %arg19[%c0_63, %c0_64] : memref<2x256xf32, #tpu.memory_space<vmem>>, vector<2x128xf32>
    tpu.vector_store %arg19[%c0_63, %c0_64], %174 {strides = array<i32>} : memref<2x256xf32, #tpu.memory_space<vmem>>, vector<2x128xf32>,
    %cst_65 = arith.constant 0.000000e+00 : f32
    %176 = vector.broadcast %cst_65 : f32 to vector<2x22xf32>
    %177 = tpu.concatenate %29, %98, %37, %172, %154, %176 in 1 : vector<2x70xf32>, vector<2x4xf32>, vector<2x12xf32>, vector<2x4xf32>, vector<2x16xf32>, vector<2x22xf32> -> vector<2x128xf32>
    %c0_66 = arith.constant 0 : index
    %c128 = arith.constant 128 : index
    %178 = vector.load %arg19[%c0_66, %c128] : memref<2x256xf32, #tpu.memory_space<vmem>>, vector<2x128xf32>
    tpu.vector_store %arg19[%c0_66, %c128], %177 {strides = array<i32>} : memref<2x256xf32, #tpu.memory_space<vmem>>, vector<2x128xf32>,
    return
  }
}

</mosaic_0001>

<bundles_post_ra>
// kernel: pim_fuse_forward.1
= control target key start
LH: loop header
LB: loop body
LE: loop exit
PB: predicated region body
PF: predicated region fallthrough
CT: control target
= control target key end

     0   :  { %s1291_s28 = smov 64   ;;  %s1292_s29 = smov 96   ;;  %vm346_vm1 = vcmask 261120   ;;  %vm348_vm2 = vcmask 523264   ;;  %vm403_vm3 = vcmask 785408   ;;  %vm423_vm4 = vcmask 1041408   ;;  %s1908_s2 = inlined_call_operand.vmem [shape: bf16[256,198], index: 2, kind: input, shape index: {}]   ;;  %s1909_s1 = inlined_call_operand.vmem [shape: bf16[6,256], index: 1, kind: input, shape index: {}]   ;;  %s1910_s4 = inlined_call_operand.vmem [shape: bf16[96,12], index: 4, kind: input, shape index: {}]   ;;  %s1911_s3 = inlined_call_operand.vmem [shape: f32[1,198], index: 3, kind: input, shape index: {}]   ;;  %s1912_s5 = inlined_call_operand.vmem [shape: f32[1,12], index: 5, kind: input, shape index: {}]   ;;  %s1913_s6 = inlined_call_operand.vmem [shape: bf16[32,64], index: 6, kind: input, shape index: {}]   ;;  %s1914_s7 = inlined_call_operand.vmem [shape: f32[1,64], index: 7, kind: input, shape index: {}]   ;;  %s1915_s9 = inlined_call_operand.vmem [shape: f32[1,32], index: 9, kind: input, shape index: {}]   ;;  %s1916_s8 = inlined_call_operand.vmem [shape: bf16[64,32], index: 8, kind: input, shape index: {}]   ;;  %s1917_s10 = inlined_call_operand.vmem [shape: bf16[32,32], index: 10, kind: input, shape index: {}]   ;;  %s1918_s11 = inlined_call_operand.vmem [shape: f32[1,32], index: 11, kind: input, shape index: {}]   ;;  %s1919_s0 = inlined_call_operand.vmem [shape: f32[2,1], index: 0, kind: input, shape index: {}]   ;;  %s1920_s12 = inlined_call_operand.vmem [shape: bf16[32,256], index: 12, kind: input, shape index: {}]   ;;  %s1921_s13 = inlined_call_operand.vmem [shape: f32[1,256], index: 13, kind: input, shape index: {}]   ;;  %s1922_s14 = inlined_call_operand.vmem [shape: f32[128,4], index: 14, kind: input, shape index: {}]   ;;  %s1923_s15 = inlined_call_operand.vmem [shape: f32[4,128], index: 15, kind: input, shape index: {}]   ;;  %s1924_s16 = inlined_call_operand.vmem [shape: f32[128,4], index: 16, kind: input, shape index: {}]   ;;  %s1925_s17 = inlined_call_operand.vmem [shape: f32[1,4], index: 17, kind: input, shape index: {}]   ;;  %s1926_s18 = inlined_call_operand.vmem [shape: f32[2,128], index: 18, kind: output, shape index: {0}]   ;;  %s1927_s19 = inlined_call_operand.vmem [shape: f32[2,256], index: 19, kind: output, shape index: {1}]  }
   0x1   :  { %1930 = sst [smem:[#allocation2_spill]] %s1908_s2  ;;  %vm606_vm5 = vcmask 1043456   ;;  %vm608_vm6 = vcmask 1045504   ;;  %vm829_vm12 = vcmask 31744   ;;  %s1299_s24 = smov 6   ;;  %vm831_vm13 = vcmask 64512  }
   0x2   :  { %1931 = sst [smem:[#allocation3_spill]] %s1909_s1  ;;  %vm833_vm14 = vcmask 97280   ;;  %s1301_s2 = smov 86   ;;  %vm959_vm15 = vcmask 572416  }
   0x3   :  { %1932 = sst [smem:[#allocation4_spill]] %s1910_s4  ;;  %s1297_s4 = smov 4  }
   0x4   :  { %1933 = sst [smem:[#allocation5_spill]] %s1911_s3 }
   0x5   :  { %s1934_s20 = sld [smem:[#allocation2_spill]] }
   0x6   :  { %s1935_s21 = sld [smem:[#allocation3_spill]] }
   0x7   :  { %s1936_s23 = sld [smem:[#allocation4_spill]] }
   0x8   :  { %s1937_s27 = sld [smem:[#allocation5_spill]] }
   0xb   :  { %v1041_v0 = vld [vmem:[%s1934_s20 + $0x70] sm:$0xf]  ;;  %v1206_v1 = vld [vmem:[%s1934_s20 + $0x74] sm:$0xf0]  ;;  %v1205_v5 = vld [vmem:[%s1934_s20 + $0x74] sm:$0xf] }
   0xc   :  { %v1105_v2 = vld [vmem:[%s1934_s20 + $0xf0] sm:$0xf]  ;;  %v1042_v3 = vor.u32 %v1206_v1, %v1041_v0  ;;  %v1222_v4 = vld [vmem:[%s1934_s20 + $0xf4] sm:$0xf0]  ;;  %v1043_v6 = vld [vmem:[%s1934_s20 + $0x78] sm:$0xf0] }
   0xd   :  { %v1106_v7 = vor.u32 %v1222_v4, %v1105_v2  ;;  %v1046_v8 = vor.u32 %v1205_v5, %v1043_v6  ;;  %v1221_v9 = vld [vmem:[%s1934_s20 + $0xf4] sm:$0xf]  ;;  %v1107_v10 = vld [vmem:[%s1934_s20 + $0xf8] sm:$0xf0]  ;;  %v1033_v11 = vld [vmem:[%s1934_s20 + $0x60] sm:$0xf] }
   0xe   :  { %275 = vmatpush.bf16.msra.mxu0 %v1042_v3  ;;  %v1110_v12 = vor.u32 %v1221_v9, %v1107_v10  ;;  %v1204_v13 = vld [vmem:[%s1934_s20 + $0x64] sm:$0xf0]  ;;  %v1097_v14 = vld [vmem:[%s1934_s20 + $0xe0] sm:$0xf]  ;;  %v1203_v18 = vld [vmem:[%s1934_s20 + $0x64] sm:$0xf] }
   0xf   :  { %v1220_v15 = vld [vmem:[%s1934_s20 + $0xe4] sm:$0xf0]  ;;  %288 = vmatpush.bf16.msra.mxu1 %v1106_v7  ;;  %301 = vmatpush.bf16.msra.mxu2 %v1046_v8  ;;  %v1034_v16 = vor.u32 %v1204_v13, %v1033_v11  ;;  %v1035_v19 = vld [vmem:[%s1934_s20 + $0x68] sm:$0xf0]  ;;  %v1219_v20 = vld [vmem:[%s1934_s20 + $0xe4] sm:$0xf] }
  0x10   :  { %v1098_v17 = vor.u32 %v1220_v15, %v1097_v14  ;;  %314 = vmatpush.bf16.msra.mxu3 %v1110_v12  ;;  %v1038_v21 = vor.u32 %v1203_v18, %v1035_v19  ;;  %v1099_v22 = vld [vmem:[%s1934_s20 + $0xe8] sm:$0xf0]  ;;  %v1025_v23 = vld [vmem:[%s1934_s20 + $0x50] sm:$0xf]  ;;  %v1202_v24 = vld [vmem:[%s1934_s20 + $0x54] sm:$0xf0] }
  0x11   :  { %v1102_v25 = vor.u32 %v1219_v20, %v1099_v22  ;;  %v1089_v26 = vld [vmem:[%s1934_s20 + $0xd0] sm:$0xf]  ;;  %v1218_v27 = vld [vmem:[%s1934_s20 + $0xd4] sm:$0xf0]  ;;  %v1201_v28 = vld [vmem:[%s1934_s20 + $0x54] sm:$0xf]  ;;  %v1026_v29 = vor.u32 %v1202_v24, %v1025_v23 }
  0x12   :  { %276 = vmatpush.bf16.msra.mxu0 %v1034_v16  ;;  %v1027_v30 = vld [vmem:[%s1934_s20 + $0x58] sm:$0xf0]  ;;  %v1217_v31 = vld [vmem:[%s1934_s20 + $0xd4] sm:$0xf]  ;;  %v1090_v33 = vor.u32 %v1218_v27, %v1089_v26  ;;  %v1017_v35 = vld [vmem:[%s1934_s20 + $0x40] sm:$0xf] }
  0x13   :  { %v1091_v32 = vld [vmem:[%s1934_s20 + $0xd8] sm:$0xf0]  ;;  %289 = vmatpush.bf16.msra.mxu1 %v1098_v17  ;;  %302 = vmatpush.bf16.msra.mxu2 %v1038_v21  ;;  %v1030_v34 = vor.u32 %v1201_v28, %v1027_v30  ;;  %v1200_v36 = vld [vmem:[%s1934_s20 + $0x44] sm:$0xf0]  ;;  %v1081_v37 = vld [vmem:[%s1934_s20 + $0xc0] sm:$0xf] }
  0x14   :  { %315 = vmatpush.bf16.msra.mxu3 %v1102_v25  ;;  %v1094_v38 = vor.u32 %v1217_v31, %v1091_v32  ;;  %v1216_v39 = vld [vmem:[%s1934_s20 + $0xc4] sm:$0xf0]  ;;  %v1199_v40 = vld [vmem:[%s1934_s20 + $0x44] sm:$0xf]  ;;  %v1019_v41 = vld [vmem:[%s1934_s20 + $0x48] sm:$0xf0]  ;;  %v1018_v44 = vor.u32 %v1200_v36, %v1017_v35 }
  0x15   :  { %v1215_v42 = vld [vmem:[%s1934_s20 + $0xc4] sm:$0xf]  ;;  %v1083_v43 = vld [vmem:[%s1934_s20 + $0xc8] sm:$0xf0]  ;;  %v1082_v45 = vor.u32 %v1216_v39, %v1081_v37  ;;  %v1022_v46 = vor.u32 %v1199_v40, %v1019_v41  ;;  %v1009_v47 = vld [vmem:[%s1934_s20 + $0x30] sm:$0xf] }
  0x16   :  { %277 = vmatpush.bf16.msra.mxu0 %v1026_v29  ;;  %v1198_v48 = vld [vmem:[%s1934_s20 + $0x34] sm:$0xf0]  ;;  %v1073_v49 = vld [vmem:[%s1934_s20 + $0xb0] sm:$0xf]  ;;  %v1086_v50 = vor.u32 %v1215_v42, %v1083_v43  ;;  %v1197_v52 = vld [vmem:[%s1934_s20 + $0x34] sm:$0xf] }
  0x17   :  { %290 = vmatpush.bf16.msra.mxu1 %v1090_v33  ;;  %303 = vmatpush.bf16.msra.mxu2 %v1030_v34  ;;  %v1214_v51 = vld [vmem:[%s1934_s20 + $0xb4] sm:$0xf0]  ;;  %v1011_v53 = vld [vmem:[%s1934_s20 + $0x38] sm:$0xf0]  ;;  %v1213_v54 = vld [vmem:[%s1934_s20 + $0xb4] sm:$0xf]  ;;  %v1010_v56 = vor.u32 %v1198_v48, %v1009_v47 }
  0x18   :  { %316 = vmatpush.bf16.msra.mxu3 %v1094_v38  ;;  %v1075_v55 = vld [vmem:[%s1934_s20 + $0xb8] sm:$0xf0]  ;;  %v1074_v57 = vor.u32 %v1214_v51, %v1073_v49  ;;  %v1014_v58 = vor.u32 %v1197_v52, %v1011_v53  ;;  %v1001_v59 = vld [vmem:[%s1934_s20 + $0x20] sm:$0xf]  ;;  %v1196_v60 = vld [vmem:[%s1934_s20 + $0x24] sm:$0xf0] }
  0x19   :  { %v1065_v61 = vld [vmem:[%s1934_s20 + $0xa0] sm:$0xf]  ;;  %v1078_v62 = vor.u32 %v1213_v54, %v1075_v55  ;;  %v1212_v63 = vld [vmem:[%s1934_s20 + $0xa4] sm:$0xf0]  ;;  %v1195_v0 = vld [vmem:[%s1934_s20 + $0x24] sm:$0xf]  ;;  %v1002_v4 = vor.u32 %v1196_v60, %v1001_v59 }
  0x1a   :  { %278 = vmatpush.bf16.msra.mxu0 %v1018_v44  ;;  %v1003_v1 = vld [vmem:[%s1934_s20 + $0x28] sm:$0xf0]  ;;  %v1211_v2 = vld [vmem:[%s1934_s20 + $0xa4] sm:$0xf]  ;;  %v1066_v5 = vor.u32 %v1212_v63, %v1065_v61  ;;  %v993_v7 = vld [vmem:[%s1934_s20 + $0x10] sm:$0xf] }
  0x1b   :  { %291 = vmatpush.bf16.msra.mxu1 %v1082_v45  ;;  %304 = vmatpush.bf16.msra.mxu2 %v1022_v46  ;;  %v1067_v3 = vld [vmem:[%s1934_s20 + $0xa8] sm:$0xf0]  ;;  %v1006_v6 = vor.u32 %v1195_v0, %v1003_v1  ;;  %v1194_v8 = vld [vmem:[%s1934_s20 + $0x14] sm:$0xf0]  ;;  %v1057_v9 = vld [vmem:[%s1934_s20 + $0x90] sm:$0xf]  ;;  %v328_v45 = vlaneseq }
  0x1c   :  { %317 = vmatpush.bf16.msra.mxu3 %v1086_v50  ;;  %v1070_v10 = vor.u32 %v1211_v2, %v1067_v3  ;;  %v1210_v11 = vld [vmem:[%s1934_s20 + $0x94] sm:$0xf0]  ;;  %v1193_v12 = vld [vmem:[%s1934_s20 + $0x14] sm:$0xf]  ;;  %v995_v13 = vld [vmem:[%s1934_s20 + $0x18] sm:$0xf0]  ;;  %v994_v16 = vor.u32 %v1194_v8, %v993_v7 }
  0x1d   :  { %v1209_v14 = vld [vmem:[%s1934_s20 + $0x94] sm:$0xf]  ;;  %v1059_v15 = vld [vmem:[%s1934_s20 + $0x98] sm:$0xf0]  ;;  %v69_v17 = vld [vmem:[%s1935_s21] sm:$0x77]  ;;  %v1058_v18 = vor.u32 %v1210_v11, %v1057_v9  ;;  %v998_v19 = vor.u32 %v1193_v12, %v995_v13 }
  0x1e   :  { %279 = vmatpush.bf16.msra.mxu0 %v1010_v56  ;;  %v985_v20 = vld [vmem:[%s1934_s20] sm:$0xf]  ;;  %v1192_v21 = vld [vmem:[%s1934_s20 + $0x4] sm:$0xf0]  ;;  %v1062_v23 = vor.u32 %v1209_v14, %v1059_v15  ;;  %v1191_v25 = vld [vmem:[%s1934_s20 + $0x4] sm:$0xf]  ;;  %v109_v29 = vunpack.c.l.b16 %v69_v17  ;;  %v110_v31 = vunpack.c.h.b16 %v69_v17 }
  0x1f   :  { %292 = vmatpush.bf16.msra.mxu1 %v1074_v57  ;;  %305 = vmatpush.bf16.msra.mxu2 %v1014_v58  ;;  %v1049_v22 = vld [vmem:[%s1934_s20 + $0x80] sm:$0xf]  ;;  %v1208_v24 = vld [vmem:[%s1934_s20 + $0x84] sm:$0xf0]  ;;  %v987_v26 = vld [vmem:[%s1934_s20 + $0x8] sm:$0xf0]  ;;  %v986_v30 = vor.u32 %v1192_v21, %v985_v20 }
  0x20   :  { %318 = vmatpush.bf16.msra.mxu3 %v1078_v62  ;;  %v1207_v27 = vld [vmem:[%s1934_s20 + $0x84] sm:$0xf]  ;;  %v1051_v28 = vld [vmem:[%s1934_s20 + $0x88] sm:$0xf0]  ;;  %v1050_v32 = vor.u32 %v1208_v24, %v1049_v22  ;;  %v990_v33 = vor.u32 %v1191_v25, %v987_v26  ;;  %v111_v35 = vpack.c.b16 %v109_v29, %v109_v29  ;;  %v112_v36 = vpack.c.b16 %v110_v31, %v110_v31  ;;  %v102_v39 = vld [vmem:[%s1937_s27] sm:$0x3] }
  0x21   :  { %v1054_v34 = vor.u32 %v1207_v27, %v1051_v28  ;;  %v1228_v37 = vld [vmem:[%s1936_s23 + $0x28] sm:$0xff]  ;;  %v1227_v38 = vld [vmem:[%s1936_s23 + $0x20] sm:$0xff]  ;;  %v104_v40 = vperm.slane %v102_v39, 0  ;;  %v105_v46 = vperm.slane %v102_v39, 1  ;;  %v329_v49 = vand.u32 127, %v328_v45  ;;  %v1226_v62 = vld [vmem:[%s1936_s23 + $0x18] sm:$0xff] }
  0x22   :  { %280 = vmatpush.bf16.msra.mxu0 %v1002_v4  ;;  %v1225_v63 = vld [vmem:[%s1936_s23 + $0x10] sm:$0xff]  ;;  %v1224_v0 = vld [vmem:[%s1936_s23 + $0x8] sm:$0xff]  ;;  %v1223_v1 = vld [vmem:[%s1936_s23] sm:$0xff]  ;;  %v1293_v29 = vmov 0   ;;  %s1296_s20 = smov 8  }
  0x23   :  { %293 = vmatpush.bf16.msra.mxu1 %v1066_v5  ;;  %306 = vmatpush.bf16.msra.mxu2 %v1006_v6  ;;  %vm330_vm0 = vcmp.lt.s32.totalorder %v329_v49, 32  ;;  %v1230_v2 = vld [vmem:[%s1913_s6 + $0x8] sm:$0xff]  ;;  %v1229_v3 = vld [vmem:[%s1913_s6] sm:$0xff]  ;;  %v1234_v14 = vld [vmem:[%s1916_s8 + $0x18] sm:$0xff] }
  0x24   :  { %319 = vmatpush.bf16.msra.mxu3 %v1070_v10  ;;  %v1233_v15 = vld [vmem:[%s1916_s8 + $0x10] sm:$0xff]  ;;  %v1231_v17 = vld [vmem:[%s1916_s8] sm:$0xff]  ;;  %1257 = vset.pattern.permute.xlu1 %v1293_v29 }
  0x25   :  { %v1265_v22 = vld [vmem:[%s1914_s7] ss:$0 sm:$0xff]  ;;  %1263 = vset.pattern.permute.xlu0 %v1293_v29  ;;  %v1175_v29 = vld [vmem:[%s1920_s12 + $0x8] sm:$0xf0] }
  0x26   :  { %281 = vmatpush.bf16.msra.mxu0 %v994_v16  ;;  %v1232_v16 = vld [vmem:[%s1916_s8 + $0x8] sm:$0xff]  ;;  %v62_v28 = vld [vmem:[%s1919_s0] sm:$0x3] }
  0x27   :  { %294 = vmatpush.bf16.msra.mxu1 %v1058_v18  ;;  %307 = vmatpush.bf16.msra.mxu2 %v998_v19  ;;  %v1236_v18 = vld [vmem:[%s1917_s10 + $0x8] sm:$0xff]  ;;  %v1235_v19 = vld [vmem:[%s1917_s10] sm:$0xff]  ;;  %s1300_s10 = smov 90  }
  0x28   :  { %320 = vmatpush.bf16.msra.mxu3 %v1062_v23 }
  0x2a   :  { %282 = vmatpush.bf16.msra.mxu0 %v986_v30  ;;  %v1266_v30 = vld [vmem:[%s1915_s9] ss:$0 sm:$0xff] }
  0x2b   :  { %295 = vmatpush.bf16.msra.mxu1 %v1050_v32  ;;  %308 = vmatpush.bf16.msra.mxu2 %v990_v33 }
  0x2c   :  { %321 = vmatpush.bf16.msra.mxu3 %v1054_v34 }
  0x2d   :  { %283 = vmatmul.bf16.vlgmr.msra.gmra.mxu0 %v111_v35 }
  0x2e   :  { %296 = vmatmul.bf16.vlgmr.msra.gmra.mxu1 %v112_v36  ;;  %309 = vmatmul.bf16.vlgmr.msra.gmra.mxu2 %v111_v35 }
  0x2f   :  { %322 = vmatmul.bf16.vlgmr.msra.gmra.mxu3 %v112_v36  ;;  %409 = vmatpush.bf16.msrb.mxu0 %v1228_v37  ;;  %v1267_v36 = vld [vmem:[%s1918_s11] ss:$0 sm:$0xff] }
  0x30   :  { %507 = vmatpush.bf16.msrb.mxu2 %v1234_v14  ;;  %547 = vmatpush.bf16.msrb.mxu3 %v1236_v18 }
  0x33   :  { %410 = vmatpush.bf16.msrb.mxu0 %v1227_v38 }
  0x34   :  { %508 = vmatpush.bf16.msrb.mxu2 %v1233_v15  ;;  %548 = vmatpush.bf16.msrb.mxu3 %v1235_v19  ;;  %v1181_v19 = vld [vmem:[%s1920_s12 + $0x10] sm:$0xf] }
  0x37   :  { %411 = vmatpush.bf16.msrb.mxu0 %v1226_v62 }
  0x38   :  { %509 = vmatpush.bf16.msrb.mxu2 %v1232_v16 }
  0x3b   :  { %412 = vmatpush.bf16.msrb.mxu0 %v1225_v63 }
  0x3c   :  { %510 = vmatpush.bf16.msrb.mxu2 %v1231_v17 }
  0x3f   :  { %413 = vmatpush.bf16.msrb.mxu0 %v1224_v0 }
  0x43   :  { %414 = vmatpush.bf16.msrb.mxu0 %v1223_v1 }
  0x47   :  { %455 = vmatpush.bf16.msra.mxu0 %v1230_v2 }
  0x4b   :  { %456 = vmatpush.bf16.msra.mxu0 %v1229_v3 }
  0xaa   :  { %v284_v41 = vpop.f32.mrf.mxu0 }
  0xab   :  { %v285_v42 = vadd.f32 %v284_v41, %v104_v40  ;;  %v297_v43 = vpop.f32.mrf.mxu1 }
  0xad   :  { %v298_v44 = vadd.f32 %v297_v43, %v285_v42 }
  0xaf   :  { %v1606_v47 = vmax.f32 %v298_v44, 0.0 }
  0xb1   :  { %v310_v48 = vpop.f32.mrf.mxu2  ;;  %420 = vrot.lane.b32.xlu1 %v1606_v47, %s1291_s28  ;;  %334 = vrot.lane.b32.xlu0 %v1606_v47, %s1292_s29  ;;  %v1615_v58 = vrot.slane %v1606_v47, 2 }
  0xb2   :  { %v311_v50 = vadd.f32 %v310_v48, %v105_v46  ;;  %v323_v51 = vpop.f32.mrf.mxu3  ;;  %v286_v52 = vpop.f32.mrf.mxu0 }
  0xb3   :  { %v299_v53 = vpop.f32.mrf.mxu1 }
  0xb4   :  { %v324_v54 = vadd.f32 %v323_v51, %v311_v50 }
  0xb6   :  { %v331_v55 = vmax.f32 %v324_v54, 0.0 }
  0xb8   :  { %v1612_v56 = vsel %vm330_vm0, %v331_v55, %v324_v54  ;;  %vm961_vm0 = vcmask 605184  }
  0xb9   :  { %v312_v57 = vpop.f32.mrf.mxu2  ;;  %v342_v59 = vrot.slane %v1612_v56, 4  ;;  %65 = vperm.xlu1 %1257, %v62_v28   ;;  %v1237_v28 = vld [vmem:[%s1920_s12 + $0x4] sm:$0xf] }
  0xba   :  { %v325_v60 = vpop.f32.mrf.mxu3 }
  0xbb   :  { %v1252_v61 = vpack.i.bf16 %v342_v59, %v1615_v58 }
  0xbd   :  { %1253 = vrot.lane.b32.xlu0 %v1252_v61, %s1291_s28 }
 0x123   :  { %v335_v4 = vpop.permute.xlu0 %334  ;;  %v421_v11 = vpop.permute.xlu1 %420 }
 0x124   :  { %v424_v12 = vsel %vm423_vm4, %v1606_v47, %v421_v11 }
 0x125   :  { %v425_v13 = vpack.c.bf16 %v424_v12, %v424_v12 }
 0x12f   :  { %v1638_v5 = vpop.permute.xlu0 %1253 }
 0x130   :  { %v1256_v6 = vunpack.i.h.bf16 %v1638_v5  ;;  %v1255_v7 = vunpack.i.l.bf16 %v1638_v5 }
 0x132   :  { %v347_v8 = vsel %vm346_vm1, %v335_v4, %v1255_v7 }
 0x133   :  { %v349_v9 = vsel %vm348_vm2, %v347_v8, %v1256_v6  ;;  %v1695_v8 = vpop.permute.xlu1 %65 }
 0x134   :  { %v350_v10 = vpack.c.bf16 %v349_v9, %v349_v9  ;;  %v68_v12 = vsub.f32 1.0, %v1695_v8  ;;  %vm749_vm7 = vcmp.eq.f32.partialorder %v1695_v8, 0.0 }
 0x136   :  { %1135 = vmatmul.msk.bf16.vlgmr.msrb.gmra.mxu0 %vm403_vm3, %v350_v10 }
 0x146   :  { %1144 = vmatmul.msk.bf16.vlgmr.msra.gmra.mxu0 %vm346_vm1, %v425_v13 }
 0x1b3   :  { %v1668_v20 = vpop.f32.mrf.mxu0 }
 0x1bb   :  { %v418_v21 = vpop.f32.mrf.mxu0 }
 0x1bc   :  { %v1240_v21 = vld [vmem:[%s1920_s12 + $0x14] sm:$0xf0] }
 0x1c3   :  { %v458_v23 = vpop.f32.mrf.mxu0 }
 0x1c4   :  { %v459_v24 = vadd.f32 %v1265_v22, %v458_v23  ;;  %v1173_v22 = vld [vmem:[%s1920_s12] sm:$0xf]  ;;  %v1182_v23 = vor.u32 %v1240_v21, %v1181_v19 }
 0x1c6   :  { %v462_v25 = vmax.f32 %v459_v24, 0.0  ;;  %v1238_v24 = vld [vmem:[%s1920_s12 + $0x4] sm:$0xf0]  ;;  %653 = vmatpush.bf16.msrb.mxu1 %v1182_v23 }
 0x1c8   :  { %v463_v26 = vpack.c.bf16 %v462_v25, %v462_v25  ;;  %v1239_v25 = vld [vmem:[%s1920_s12 + $0x14] sm:$0xf] }
 0x1ca   :  { %1161 = vmatmul.msk.bf16.vlgmr.msrb.gmra.mxu2 %vm348_vm2, %v463_v26  ;;  %v1183_v26 = vld [vmem:[%s1920_s12 + $0x18] sm:$0xf0]  ;;  %s1294_s12 = smov 32  }
 0x1cb   :  { %v460_v27 = vpop.f32.mrf.mxu0 }
 0x1cc   :  { %v1186_v27 = vor.u32 %v1239_v25, %v1183_v26 }
 0x1ce   :  { %666 = vmatpush.bf16.msra.mxu2 %v1186_v27 }
 0x24d   :  { %v512_v31 = vpop.f32.mrf.mxu2 }
 0x24e   :  { %v513_v32 = vadd.f32 %v1266_v30, %v512_v31  ;;  %v1174_v30 = vor.u32 %v1238_v24, %v1173_v22  ;;  %v1178_v31 = vor.u32 %v1237_v28, %v1175_v29 }
 0x250   :  { %v516_v33 = vmax.f32 %v513_v32, 0.0  ;;  %654 = vmatpush.bf16.msrb.mxu1 %v1174_v30  ;;  %667 = vmatpush.bf16.msra.mxu2 %v1178_v31 }
 0x252   :  { %v517_v34 = vpack.c.bf16 %v516_v33, %v516_v33 }
 0x254   :  { %1170 = vmatmul.msk.bf16.vlgmr.msrb.gmra.mxu3 %vm346_vm1, %v517_v34 }
 0x255   :  { %v514_v35 = vpop.f32.mrf.mxu2 }
 0x2d7   :  { %v550_v37 = vpop.f32.mrf.mxu3 }
 0x2d8   :  { %v1684_v38 = vadd.f32 %v1267_v36, %v550_v37 }
 0x2da   :  { %v1687_v39 = vrot.slane %v1684_v38, 2  ;;  %v559_v40 = vmax.f32 %v1684_v38, 0.0 }
 0x2dc   :  { %v557_v41 = vadd.f32 %v1687_v39, %v1684_v38  ;;  %v561_v42 = vrot.slane %v559_v40, 2  ;;  %v594_v15 = vmul.f32 %v1687_v39, %v68_v12 }
 0x2de   :  { %v558_v43 = vmax.f32 %v557_v41, %v1684_v38 }
 0x2df   :  { %v552_v44 = vpop.f32.mrf.mxu3 }
 0x2e0   :  { %v563_v45 = vmax.f32 %v558_v43, %v561_v42  ;;  %v1738_v42 = vld [vmem:[%s1921_s13] sm:$0x3] }
 0x2e1   :  { %v617_v43 = vperm.slane %v1738_v42, 0  ;;  %v618_v22 = vperm.slane %v1738_v42, 1 }
 0x2e2   :  { %v564_v46 = vsub.f32 %v557_v41, %v563_v45  ;;  %v567_v48 = vsub.f32 %v1684_v38, %v563_v45  ;;  %v571_v49 = vrot.slane %v563_v45, 6  ;;  %v576_v50 = vsub.f32 0.0, %v563_v45 }
 0x2e4   :  { %v565_v51 = vmul.f32 1.442695, %v564_v46  ;;  %v568_v52 = vmul.f32 1.442695, %v567_v48  ;;  %v573_v53 = vsub.f32 %v1684_v38, %v571_v49  ;;  %v577_v54 = vmul.f32 1.442695, %v576_v50 }
 0x2e6   :  { %1269 = vpow2.f32 %v565_v51  ;;  %v574_v55 = vmul.f32 1.442695, %v573_v53 }
 0x2e7   :  { %1271 = vpow2.f32 %v568_v52 }
 0x2e8   :  { %1273 = vpow2.f32 %v574_v55 }
 0x2e9   :  { %1275 = vpow2.f32 %v577_v54 }
 0x2ec   :  { %v1270_v57 = vpop.eup %1269 }
 0x2ed   :  { %v1272_v59 = vpop.eup %1271  ;;  %v579_v60 = vmul.f32 2.0, %v1270_v57 }
 0x2ee   :  { %v1274_v61 = vpop.eup %1273 }
 0x2ef   :  { %v1276_v62 = vpop.eup %1275  ;;  %v580_v63 = vadd.f32 %v1272_v59, %v579_v60  ;;  %v582_v0 = vrot.slane %v1274_v61, 2  ;;  %v727_v61 = vld [vmem:[%s1922_s14 + $0x78] sm:$0xff] }
 0x2f0   :  { %v587_v1 = vmul.f32 2.0, %v1276_v62  ;;  %v726_v62 = vld [vmem:[%s1922_s14 + $0x70] sm:$0xff]  ;;  %728 = vmatpush.msra.mxu3 %v727_v61 }
 0x2f1   :  { %v584_v2 = vadd.f32 %v582_v0, %v580_v63  ;;  %v725_v63 = vld [vmem:[%s1922_s14 + $0x68] sm:$0xff] }
 0x2f2   :  { %v588_v3 = vadd.f32 %v1272_v59, %v587_v1  ;;  %729 = vmatpush.msra.mxu3 %v726_v62  ;;  %v723_v1 = vld [vmem:[%s1922_s14 + $0x58] sm:$0xff] }
 0x2f3   :  { %1277 = vlog2.f32 %v584_v2  ;;  %v722_v2 = vld [vmem:[%s1922_s14 + $0x50] sm:$0xff] }
 0x2f4   :  { %v589_v4 = vadd.f32 %v588_v3, %v582_v0  ;;  %730 = vmatpush.msra.mxu3 %v725_v63  ;;  %v724_v0 = vld [vmem:[%s1922_s14 + $0x60] sm:$0xff]  ;;  %v721_v3 = vld [vmem:[%s1922_s14 + $0x48] sm:$0xff] }
 0x2f6   :  { %1279 = vlog2.f32 %v589_v4  ;;  %731 = vmatpush.msra.mxu3 %v724_v0  ;;  %v720_v4 = vld [vmem:[%s1922_s14 + $0x40] sm:$0xff] }
 0x2f8   :  { %732 = vmatpush.msra.mxu3 %v723_v1 }
 0x2f9   :  { %v1278_v6 = vpop.eup %1277 }
 0x2fa   :  { %v586_v9 = vmul.f32 0.6931472, %v1278_v6  ;;  %733 = vmatpush.msra.mxu3 %v722_v2  ;;  %v719_v6 = vld [vmem:[%s1922_s14 + $0x38] sm:$0xff] }
 0x2fc   :  { %v1280_v10 = vpop.eup %1279  ;;  %734 = vmatpush.msra.mxu3 %v721_v3 }
 0x2fd   :  { %v591_v11 = vmul.f32 0.6931472, %v1280_v10  ;;  %v717_v10 = vld [vmem:[%s1922_s14 + $0x28] sm:$0xff] }
 0x2fe   :  { %735 = vmatpush.msra.mxu3 %v720_v4 }
 0x2ff   :  { %v592_v13 = vsub.f32 %v586_v9, %v591_v11  ;;  %v718_v9 = vld [vmem:[%s1922_s14 + $0x30] sm:$0xff]  ;;  %v716_v11 = vld [vmem:[%s1922_s14 + $0x20] sm:$0xff] }
 0x300   :  { %736 = vmatpush.msra.mxu3 %v719_v6 }
 0x301   :  { %v593_v14 = vmul.f32 %v592_v13, %v1695_v8  ;;  %v714_v13 = vld [vmem:[%s1922_s14 + $0x10] sm:$0xff] }
 0x302   :  { %737 = vmatpush.msra.mxu3 %v718_v9 }
 0x303   :  { %v595_v16 = vadd.f32 %v594_v15, %v593_v14  ;;  %v713_v14 = vld [vmem:[%s1922_s14 + $0x8] sm:$0xff]  ;;  %v712_v15 = vld [vmem:[%s1922_s14] sm:$0xff] }
 0x304   :  { %738 = vmatpush.msra.mxu3 %v717_v10 }
 0x305   :  { %v598_v17 = vrot.slane %v595_v16, 6 }
 0x306   :  { %739 = vmatpush.msra.mxu3 %v716_v11 }
 0x307   :  { %v1258_v18 = vpack.i.bf16 %v1612_v56, %v598_v17 }
 0x309   :  { %1259 = vrot.lane.b32.xlu2 %v1258_v18, %s1292_s29 }
 0x363   :  { %v1260_v32 = vpop.permute.xlu2 %1259 }
 0x364   :  { %v1262_v33 = vunpack.i.h.bf16 %v1260_v32  ;;  %v1261_v34 = vunpack.i.l.bf16 %v1260_v32  ;;  %v840_v32 = vld [vmem:[%s1923_s15] sm:$0xf]  ;;  %s1295_s15 = smov 12  }
 0x365   :  { %1189 = vmatpush.msk.msrb.mxu2 %vm606_vm5, %v840_v32  ;;  %v904_v32 = vld [vmem:[%s1924_s16 + $0x70] sm:$0xff] }
 0x366   :  { %v605_v35 = vsel %vm423_vm4, %v1615_v58, %v1261_v34 }
 0x367   :  { %v607_v36 = vsel %vm606_vm5, %v605_v35, %v1262_v33 }
 0x368   :  { %v609_v37 = vsel %vm608_vm6, %v607_v36, %v1255_v7 }
 0x369   :  { %v610_v40 = vpack.c.bf16 %v609_v37, %v609_v37 }
 0x36b   :  { %622 = vrot.lane.b32.xlu2 %v610_v40, %s1294_s12 }
 0x3c5   :  { %v623_v41 = vpop.permute.xlu2 %622 }
 0x3c6   :  { %1187 = vmatmul.msk.bf16.vlgmr.msrb.gmra.mxu1 %vm346_vm1, %v623_v41  ;;  %1188 = vmatmul.msk.bf16.vlgmr.msra.gmra.mxu2 %vm346_vm1, %v623_v41 }
 0x443   :  { %v656_v44 = vpop.f32.mrf.mxu1 }
 0x444   :  { %v1741_v5 = vadd.f32 %v656_v44, %v617_v43 }
 0x446   :  { %v674_v7 = vrot.slane %v1741_v5, 2  ;;  %v677_v46 = vrot.slane %v1741_v5, 4  ;;  %v680_v50 = vrot.slane %v1741_v5, 6 }
 0x448   :  { %v676_v45 = vadd.f32 %v674_v7, %v1741_v5 }
 0x449   :  { %v669_v48 = vpop.f32.mrf.mxu2 }
 0x44a   :  { %v679_v49 = vadd.f32 %v677_v46, %v676_v45  ;;  %v670_v28 = vadd.f32 %v669_v48, %v618_v22  ;;  %v1264_v22 = vld [vmem:[%s1912_s5] ss:$0 sm:$0xff]  ;;  %s1298_s5 = smov 74  }
 0x44b   :  { %v658_v51 = vpop.f32.mrf.mxu1 }
 0x44c   :  { %v682_v52 = vadd.f32 %v680_v50, %v679_v49  ;;  %v685_v53 = vmul.f32 0.33333334, %v679_v49 }
 0x44e   :  { %v683_v54 = vmul.f32 0.25, %v682_v52  ;;  %v686_v57 = vmul.f32 %v685_v53, %v68_v12  ;;  %v715_v12 = vld [vmem:[%s1922_s14 + $0x18] sm:$0xff] }
 0x44f   :  { %740 = vmatpush.msra.mxu3 %v715_v12 }
 0x450   :  { %v684_v55 = vmul.f32 %v683_v54, %v1695_v8 }
 0x451   :  { %v671_v59 = vpop.f32.mrf.mxu2  ;;  %741 = vmatpush.msra.mxu3 %v714_v13 }
 0x452   :  { %v687_v60 = vadd.f32 %v686_v57, %v684_v55 }
 0x453   :  { %742 = vmatpush.msra.mxu3 %v713_v14 }
 0x454   :  { %695 = vrot.lane.b32.xlu2 %v687_v60, %s1292_s29  ;;  %692 = vrot.lane.b32.xlu1 %v687_v60, %s1291_s28 }
 0x455   :  { %689 = vrot.lane.b32.xlu0 %v687_v60, %s1294_s12  ;;  %743 = vmatpush.msra.mxu3 %v712_v15 }
 0x45c   :  { %873 = vrot.lane.b32.xlu2 %v1741_v5, %s1291_s28  ;;  %870 = vrot.lane.b32.xlu1 %v1741_v5, %s1294_s12 }
 0x45d   :  { %867 = vrot.lane.b32.xlu0 %v1741_v5, %s1292_s29 }
 0x4ae   :  { %v696_v19 = vpop.permute.xlu2 %695 }
 0x4c6   :  { %v693_v16 = vpop.permute.xlu1 %692 }
 0x4c7   :  { %v690_v17 = vpop.permute.xlu0 %689 }
 0x4c8   :  { %v698_v18 = vsel %vm346_vm1, %v687_v60, %v690_v17 }
 0x4c9   :  { %v699_v21 = vsel %vm348_vm2, %v698_v18, %v693_v16 }
 0x4ca   :  { %v700_v23 = vsel %vm403_vm3, %v699_v21, %v696_v19 }
 0x4cb   :  { %v702_v24 = vrot.slane %v700_v23, 6  ;;  %v704_v25 = vrot.slane %v700_v23, 4  ;;  %v706_v26 = vrot.slane %v700_v23, 2 }
 0x4cd   :  { %v708_v27 = vsel %vm423_vm4, %v700_v23, %v702_v24 }
 0x4ce   :  { %v709_v29 = vsel %vm606_vm5, %v708_v27, %v704_v25 }
 0x4cf   :  { %v710_v30 = vsel %vm608_vm6, %v709_v29, %v706_v26  ;;  %v417_v29 = vadd.f32 %v1264_v22, %v1668_v20  ;;  %v903_v20 = vld [vmem:[%s1924_s16 + $0x68] sm:$0xff] }
 0x4d0   :  { %v711_v31 = vmul.f32 %v710_v30, %v670_v28 }
 0x4d1   :  { %v945_v30 = vrot.slane %v417_v29, 4 }
 0x4d2   :  { %744 = vmatmul.f32.vlgmr.msra.gmra.mxu3 %v711_v31  ;;  %v905_v31 = vld [vmem:[%s1924_s16 + $0x78] sm:$0xff] }
 0x4d3   :  { %910 = vmatpush.msra.mxu1 %v905_v31 }
 0x4d5   :  { %911 = vmatpush.msra.mxu1 %v904_v32 }
 0x4d7   :  { %912 = vmatpush.msra.mxu1 %v903_v20 }
 0x555   :  { %v745_v33 = vpop.f32.mrf.mxu3 }
 0x556   :  { %v748_v34 = vmul.f32 0.17677669, %v745_v33  ;;  %v900_v33 = vld [vmem:[%s1924_s16 + $0x50] sm:$0xff] }
 0x558   :  { %v751_v35 = vrot.slane %v748_v34, 6  ;;  %v754_v37 = vrot.slane %v748_v34, 2 }
 0x55a   :  { %v753_v36 = vsel %vm749_vm7, -1e+30, %v751_v35  ;;  %v756_v42 = vmax.f32 %v748_v34, %v754_v37  ;;  %v898_v35 = vld [vmem:[%s1924_s16 + $0x40] sm:$0xff]  ;;  %v896_v37 = vld [vmem:[%s1924_s16 + $0x30] sm:$0xff] }
 0x55b   :  { %v758_v40 = vrot.slane %v753_v36, 4 }
 0x55d   :  { %v760_v41 = vmax.f32 %v748_v34, %v758_v40  ;;  %v895_v40 = vld [vmem:[%s1924_s16 + $0x28] sm:$0xff] }
 0x55f   :  { %v762_v43 = vrot.slane %v760_v41, 4  ;;  %v894_v41 = vld [vmem:[%s1924_s16 + $0x20] sm:$0xff] }
 0x561   :  { %v764_v44 = vmax.f32 %v756_v42, %v762_v43  ;;  %v893_v42 = vld [vmem:[%s1924_s16 + $0x18] sm:$0xff]  ;;  %v892_v43 = vld [vmem:[%s1924_s16 + $0x10] sm:$0xff] }
 0x563   :  { %v765_v7 = vsub.f32 %v748_v34, %v764_v44  ;;  %v769_v45 = vrot.slane %v764_v44, 6  ;;  %v774_v46 = vrot.slane %v764_v44, 4  ;;  %v779_v54 = vsub.f32 %v753_v36, %v764_v44  ;;  %v897_v36 = vld [vmem:[%s1924_s16 + $0x38] sm:$0xff]  ;;  %v871_v44 = vpop.permute.xlu1 %870 }
 0x565   :  { %v771_v48 = vsub.f32 %v748_v34, %v769_v45  ;;  %v776_v49 = vsub.f32 %v748_v34, %v774_v46  ;;  %v766_v51 = vmul.f32 1.442695, %v765_v7  ;;  %v780_v8 = vmul.f32 1.442695, %v779_v54  ;;  %v899_v34 = vld [vmem:[%s1924_s16 + $0x48] sm:$0xff]  ;;  %v868_v7 = vpop.permute.xlu0 %867  ;;  %v874_v46 = vpop.permute.xlu2 %873 }
 0x566   :  { %v891_v45 = vld [vmem:[%s1924_s16 + $0x8] sm:$0xff] }
 0x567   :  { %v772_v52 = vmul.f32 1.442695, %v771_v48  ;;  %v777_v53 = vmul.f32 1.442695, %v776_v49  ;;  %v890_v48 = vld [vmem:[%s1924_s16] sm:$0xff] }
 0x569   :  { %1281 = vpow2.f32 %v772_v52 }
 0x56a   :  { %1283 = vpow2.f32 %v777_v53 }
 0x56b   :  { %1285 = vpow2.f32 %v766_v51 }
 0x56c   :  { %1287 = vpow2.f32 %v780_v8 }
 0x56f   :  { %v1282_v55 = vpop.eup %1281 }
 0x570   :  { %v1284_v57 = vpop.eup %1283  ;;  %v783_v59 = vrot.slane %v1282_v55, 2 }
 0x571   :  { %v1286_v60 = vpop.eup %1285  ;;  %v787_v62 = vrot.slane %v1284_v57, 4 }
 0x572   :  { %v785_v61 = vadd.f32 %v1286_v60, %v783_v59  ;;  %v1288_v0 = vpop.eup %1287 }
 0x574   :  { %v789_v63 = vadd.f32 %v787_v62, %v785_v61 }
 0x576   :  { %v790_v1 = vadd.f32 %v1288_v0, %v789_v63 }
 0x578   :  { %1289 = vrcp.f32 %v790_v1  ;;  %v802_v6 = vand.u32 2147483648, %v790_v1  ;;  %v800_v10 = vand.u32 2147483647, %v790_v1  ;;  %vm796_vm9 = vweird.f32 %v790_v1 }
 0x57a   :  { %v803_v12 = vor.u32 1.1754944e-38, %v802_v6  ;;  %vm801_vm11 = vcmp.eq.f32.partialorder %v800_v10, 8.507059e+37 }
 0x57e   :  { %v1290_v2 = vpop.eup %1289 }
 0x57f   :  { %v792_v3 = vmul.f32 %v1290_v2, %v790_v1  ;;  %vm797_vm8 = vweird.f32 %v1290_v2 }
 0x580   :  { %vm798_vm10 = vmor %vm796_vm9, %vm797_vm8 }
 0x581   :  { %v793_v4 = vsub.f32 1.0, %v792_v3 }
 0x583   :  { %v794_v9 = vmul.f32 %v1290_v2, %v793_v4 }
 0x585   :  { %v795_v11 = vadd.f32 %v1290_v2, %v794_v9 }
 0x587   :  { %v799_v13 = vsel %vm798_vm10, %v1290_v2, %v795_v11 }
 0x588   :  { %v804_v14 = vsel %vm801_vm11, %v803_v12, %v799_v13 }
 0x589   :  { %v814_v15 = vmul.f32 %v1288_v0, %v804_v14  ;;  %v811_v16 = vrot.slane %v804_v14, 4  ;;  %v808_v17 = vrot.slane %v804_v14, 6  ;;  %v1819_v18 = vmul.f32 %v1286_v60, %v804_v14 }
 0x58b   :  { %826 = vrot.lane.b32.xlu2 %v814_v15, %s1295_s15  ;;  %v813_v19 = vmul.f32 %v1284_v57, %v811_v16  ;;  %v810_v21 = vmul.f32 %v1282_v55, %v808_v17  ;;  %v835_v23 = vrot.slane %v814_v15, 2  ;;  %v876_v57 = vsel %vm346_vm1, %v868_v7, %v1741_v5  ;;  %v1268_v5 = vld [vmem:[%s1925_s17] ss:$0 sm:$0xff] }
 0x58c   :  { %v877_v59 = vsel %vm348_vm2, %v876_v57, %v871_v44 }
 0x58d   :  { %v821_v24 = vrot.slane %v813_v19, 4  ;;  %v816_v25 = vrot.slane %v810_v21, 2  ;;  %v837_v26 = vsel %vm423_vm4, %v1819_v18, %v810_v21  ;;  %v878_v61 = vsel %vm403_vm3, %v877_v59, %v874_v46 }
 0x58e   :  { %v838_v27 = vsel %vm606_vm5, %v837_v26, %v813_v19  ;;  %vm963_vm4 = vcmask 703488   ;;  %vm965_vm5 = vcmask 736256  }
 0x58f   :  { %822 = vrot.lane.b32.xlu1 %v821_v24, %s1296_s20  ;;  %817 = vrot.lane.b32.xlu0 %v816_v25, %s1297_s4  ;;  %v839_v28 = vsel %vm608_vm6, %v838_v27, %v835_v23  ;;  %vm967_vm6 = vcmask 867328  }
 0x590   :  { %1190 = vmatmul.msk.f32.vlgmr.msrb.gmra.mxu2 %vm829_vm12, %v839_v28 }
 0x597   :  { %946 = vrot.lane.b32.xlu1 %v945_v30, %s1298_s5  ;;  %941 = vrot.lane.b32.xlu0 %v680_v50, %s1299_s24  ;;  %v902_v50 = vld [vmem:[%s1924_s16 + $0x60] sm:$0xff] }
 0x598   :  { %913 = vmatpush.msra.mxu1 %v902_v50 }
 0x59f   :  { %931 = vrot.lane.b32.xlu1 %v1687_v39, %s1294_s12  ;;  %v901_v39 = vld [vmem:[%s1924_s16 + $0x58] sm:$0xff] }
 0x5a0   :  { %914 = vmatpush.msra.mxu1 %v901_v39 }
 0x5a2   :  { %915 = vmatpush.msra.mxu1 %v900_v33 }
 0x5a4   :  { %916 = vmatpush.msra.mxu1 %v899_v34 }
 0x5a6   :  { %917 = vmatpush.msra.mxu1 %v898_v35 }
 0x5a8   :  { %918 = vmatpush.msra.mxu1 %v897_v36 }
 0x5aa   :  { %919 = vmatpush.msra.mxu1 %v896_v37 }
 0x5ac   :  { %920 = vmatpush.msra.mxu1 %v895_v40 }
 0x5ae   :  { %921 = vmatpush.msra.mxu1 %v894_v41 }
 0x5b0   :  { %922 = vmatpush.msra.mxu1 %v893_v42 }
 0x5b2   :  { %923 = vmatpush.msra.mxu1 %v892_v43 }
 0x5b4   :  { %924 = vmatpush.msra.mxu1 %v891_v45 }
 0x5b6   :  { %925 = vmatpush.msra.mxu1 %v890_v48 }
 0x5e5   :  { %v827_v53 = vpop.permute.xlu2 %826 }
 0x601   :  { %v823_v49 = vpop.permute.xlu1 %822  ;;  %v818_v51 = vpop.permute.xlu0 %817 }
 0x602   :  { %v830_v52 = vsel %vm829_vm12, %v1819_v18, %v818_v51 }
 0x603   :  { %v832_v54 = vsel %vm831_vm13, %v830_v52, %v823_v49 }
 0x604   :  { %v834_v8 = vsel %vm833_vm14, %v832_v54, %v827_v53 }
 0x605   :  { %v955_v55 = vrot.slane %v834_v8, 4 }
 0x607   :  { %956 = vrot.lane.b32.xlu0 %v955_v55, %s1300_s10 }
 0x609   :  { %v942_v11 = vpop.permute.xlu0 %941  ;;  %v947_v12 = vpop.permute.xlu1 %946 }
 0x60a   :  { %v960_v13 = vsel %vm959_vm15, %v1612_v56, %v942_v11 }
 0x60b   :  { %v962_v15 = vsel %vm961_vm0, %v960_v13, %v947_v12 }
 0x611   :  { %v932_v21 = vpop.permute.xlu1 %931 }
 0x613   :  { %v864_v60 = vpop.f32.mrf.mxu2 }
 0x614   :  { %v879_v62 = vmul.f32 %v878_v61, %v864_v60 }
 0x616   :  { %v881_v63 = vrot.slane %v879_v62, 2  ;;  %v884_v1 = vrot.slane %v879_v62, 4  ;;  %v887_v2 = vrot.slane %v879_v62, 6 }
 0x618   :  { %v883_v0 = vadd.f32 %v881_v63, %v879_v62 }
 0x61a   :  { %v886_v3 = vadd.f32 %v884_v1, %v883_v0 }
 0x61c   :  { %v889_v4 = vadd.f32 %v887_v2, %v886_v3 }
 0x61e   :  { %926 = vmatmul.f32.vlgmr.msra.gmra.mxu1 %v889_v4  ;;  %930 = vst [vmem:[%s1926_s18] sm:$0x3] %v889_v4 }
 0x679   :  { %v957_v16 = vpop.permute.xlu0 %956 }
 0x69b   :  { %v927_v6 = vpop.f32.mrf.mxu1 }
 0x69c   :  { %v928_v9 = vadd.f32 %v1268_v5, %v927_v6 }
 0x69e   :  { %v950_v10 = vrot.slane %v928_v9, 4 }
 0x6a0   :  { %951 = vrot.lane.b32.xlu2 %v950_v10, %s1301_s2 }
 0x6a8   :  { %934 = vrot.lane.b32.xlu2 %v1606_v47, %s1294_s12  ;;  %v937_v47 = vsel %vm346_vm1, %v1684_v38, %v932_v21 }
 0x6fa   :  { %v952_v14 = vpop.permute.xlu2 %951 }
 0x6fb   :  { %v964_v17 = vsel %vm963_vm4, %v962_v15, %v952_v14 }
 0x6fc   :  { %v966_v18 = vsel %vm965_vm5, %v964_v17, %v957_v16 }
 0x6fd   :  { %v968_v19 = vsel %vm967_vm6, %v966_v18, 0.0 }
 0x6fe   :  { %970 = vst.sshfl [vmem:[#allocation1] sm:$0xff pattern:$0x73625140] %v968_v19 }
 0x702   :  { %v935_v22 = vpop.permute.xlu2 %934 }
 0x703   :  { %v938_v23 = vsel %vm348_vm2, %v937_v47, %v935_v22 }
 0x704   :  { %v939_v56 = vsel %vm403_vm3, %v938_v23, %v1615_v58 }
 0x705   :  { %940 = vst [vmem:[%s1927_s19] sm:$0x3] %v939_v56  ;;  %v972_v24 = vld [vmem:[#allocation1 + $0x2] ss:$4 sm:$0xff] }
 0x706   :  { %974 = vst [vmem:[%s1927_s19 + $0x2] sm:$0x3] %v972_v24 }

</bundles_post_ra>
